<compile_context>
chip_gen: v7x
topology: tpu7x:2x2x1
jax: 0.10.0
libtpu: 0.0.40
codegen_flags: <defaults>
</compile_context>

<pallas_src>
import functools

import jax
import jax.numpy as jnp
import numpy as np
from jax.experimental import pallas as pl
from jax.experimental.pallas import tpu as pltpu


def _rnn_kernel(x_ref,    # (T*B, D)  time-major, flattened over (T, B)
                w_ref,    # (D+4H, H) weight slab (see wrapper)
                b_ref,    # (3, H)    bias slab   (see wrapper)
                out_ref,  # (B, 2)
                *, T, B, D, H):
    # --- static, sublane-aligned slices of the packed slabs (read once) -----
    wih1 = w_ref[0:D, :]                       # (D, H)
    whh1 = w_ref[D:D + H, :]                   # (H, H)
    wih2 = w_ref[D + H:D + 2 * H, :]           # (H, H)
    whh2 = w_ref[D + 2 * H:D + 3 * H, :]       # (H, H)
    wfc = w_ref[D + 3 * H:D + 4 * H, :]        # (H, H), only cols 0:2 nonzero

    b1 = b_ref[0:1, :]                                   # (1, H)
    b2b = jnp.broadcast_to(b_ref[1:2, :], (B, H))        # hoisted broadcast
    bfc = b_ref[2:3, :]                                   # (1, H), cols 2.. are 0

    # --- hoisted input projection for ALL timesteps --------------------------
    # rows [t*B:(t+1)*B] belong to timestep t; layer-1 bias folded in.
    xproj = (jnp.dot(x_ref[...], wih1, preferred_element_type=jnp.float32)
             + b1)                                        # (T*B, H)

    # --- time recurrence, fully unrolled (small static T) --------------------
    h1 = jnp.zeros((B, H), jnp.float32)
    h2 = jnp.zeros((B, H), jnp.float32)
    for t in range(T):
        # Layer-2 recurrent partial: depends only on the PREVIOUS h2, so it
        # is issued first and hides under layer 1's MXU + tanh latency.
        h2_rec = (jnp.dot(h2, whh2, preferred_element_type=jnp.float32)
                  + b2b)                                  # (B, H)
        # Layer 1: h1 = tanh(xproj[t] + h1 @ Whh1^T)
        h1 = jnp.tanh(xproj[t * B:(t + 1) * B, :]
                      + jnp.dot(h1, whh1, preferred_element_type=jnp.float32))
        # Layer 2: h2 = tanh(h1 @ Wih2^T + h2_rec)
        h2 = jnp.tanh(jnp.dot(h1, wih2, preferred_element_type=jnp.float32)
                      + h2_rec)

    # --- fc head + tanh on the last layer-2 hidden state ---------------------
    fc = jnp.tanh(jnp.dot(h2, wfc, preferred_element_type=jnp.float32)
                  + bfc)                                  # (B, H), cols 2.. = 0
    out_ref[...] = fc[:, 0:2]


@jax.jit
def rnn_model_forward(x, params):
    """x: (B, T, D) float32 (batch_first, like PyTorch). Returns (B, 2)."""
    B, T, D = x.shape
    H = params["w_hh1"].shape[0]

    # Time-major, flattened over (T, B): rows [t*B:(t+1)*B] are timestep t.
    x2d = jnp.transpose(x, (1, 0, 2)).reshape(T * B, D)

    # One weight slab (D+4H, H): PyTorch stores W as (out, in); kernel wants
    # x @ W, so transpose. fc weight column-padded to H lanes (zeros).
    wfc_pad = jnp.zeros((H, H), jnp.float32).at[:, 0:2].set(params["w_fc"].T)
    w_slab = jnp.concatenate(
        [params["w_ih1"].T, params["w_hh1"].T,
         params["w_ih2"].T, params["w_hh2"].T, wfc_pad], axis=0)

    # One bias slab (3, H): [b_ih1+b_hh1; b_ih2+b_hh2; b_fc padded].
    bfc_pad = jnp.zeros((H,), jnp.float32).at[0:2].set(params["b_fc"])
    b_slab = jnp.stack(
        [params["b_ih1"] + params["b_hh1"],
         params["b_ih2"] + params["b_hh2"],
         bfc_pad], axis=0)

    vmem = lambda: pl.BlockSpec(memory_space=pltpu.MemorySpace.VMEM)

    return pl.pallas_call(
        functools.partial(_rnn_kernel, T=T, B=B, D=D, H=H),
        out_shape=jax.ShapeDtypeStruct((B, 2), jnp.float32),
        in_specs=[vmem(), vmem(), vmem()],   # everything resident in VMEM
        out_specs=vmem(),
    )(x2d, w_slab, b_slab)


def init_params(key, input_size, hidden_size):
    """Deterministic init matching PyTorch nn.RNN / nn.Linear shapes."""
    ks = jax.random.split(key, 10)
    s = 1.0 / np.sqrt(hidden_size)
    u = lambda k, shape, scale: jax.random.uniform(
        k, shape, jnp.float32, minval=-scale, maxval=scale)
    return {
        "w_ih1": u(ks[0], (hidden_size, input_size), s),
        "w_hh1": u(ks[1], (hidden_size, hidden_size), s),
        "b_ih1": u(ks[2], (hidden_size,), s),
        "b_hh1": u(ks[3], (hidden_size,), s),
        "w_ih2": u(ks[4], (hidden_size, hidden_size), s),
        "w_hh2": u(ks[5], (hidden_size, hidden_size), s),
        "b_ih2": u(ks[6], (hidden_size,), s),
        "b_hh2": u(ks[7], (hidden_size,), s),
        "w_fc": u(ks[8], (2, hidden_size), s),
        "b_fc": u(ks[9], (2,), s),
    }


def reference_forward(x, p):
    """Pure-JAX reference of the PyTorch forward pass."""
    B, T, D = x.shape
    H = p["w_hh1"].shape[0]
    h1 = jnp.zeros((B, H), jnp.float32)
    h2 = jnp.zeros((B, H), jnp.float32)

    def step(carry, x_t):
        h1, h2 = carry
        h1 = jnp.tanh(x_t @ p["w_ih1"].T + p["b_ih1"]
                      + h1 @ p["w_hh1"].T + p["b_hh1"])
        h2 = jnp.tanh(h1 @ p["w_ih2"].T + p["b_ih2"]
                      + h2 @ p["w_hh2"].T + p["b_hh2"])
        return (h1, h2), None

    (h1, h2), _ = jax.lax.scan(step, (h1, h2), jnp.transpose(x, (1, 0, 2)))
    return jnp.tanh(h2 @ p["w_fc"].T + p["b_fc"])


if __name__ == "__main__":
    B, T, D, H = 2, 8, 8, 32  # batch, seq len, input features, hidden size

    key = jax.random.PRNGKey(0)
    k_x, k_p = jax.random.split(key)
    x = jax.random.normal(k_x, (B, T, D), jnp.float32)
    params = init_params(k_p, D, H)

    out = jax.block_until_ready(rnn_model_forward(x, params))
    ref = jax.block_until_ready(reference_forward(x, params))

    np.testing.assert_allclose(np.asarray(out), np.asarray(ref),
                               rtol=1e-5, atol=1e-5)
    print("KERNEL_OK")
</pallas_src>

<mosaic_0001>
module attributes {stable_mosaic.version = 11 : i64} {
  func.func @_rnn_kernel(%arg0: memref<16x8xf32, #tpu.memory_space<vmem>>, %arg1: memref<136x32xf32, #tpu.memory_space<vmem>>, %arg2: memref<3x32xf32, #tpu.memory_space<vmem>>, %arg3: memref<2x2xf32, #tpu.memory_space<vmem>>) attributes {dimension_semantics = [], scalar_prefetch = 0 : i64, scratch_operands = 0 : i64, tpu.core_type = #tpu.core_type<tc>} {
    %c0 = arith.constant 0 : index
    %c0_0 = arith.constant 0 : index
    %0 = vector.load %arg1[%c0, %c0_0] : memref<136x32xf32, #tpu.memory_space<vmem>>, vector<8x32xf32>
    %c8 = arith.constant 8 : index
    %c0_1 = arith.constant 0 : index
    %1 = vector.load %arg1[%c8, %c0_1] : memref<136x32xf32, #tpu.memory_space<vmem>>, vector<32x32xf32>
    %c40 = arith.constant 40 : index
    %c0_2 = arith.constant 0 : index
    %2 = vector.load %arg1[%c40, %c0_2] : memref<136x32xf32, #tpu.memory_space<vmem>>, vector<32x32xf32>
    %c72 = arith.constant 72 : index
    %c0_3 = arith.constant 0 : index
    %3 = vector.load %arg1[%c72, %c0_3] : memref<136x32xf32, #tpu.memory_space<vmem>>, vector<32x32xf32>
    %c104 = arith.constant 104 : index
    %c0_4 = arith.constant 0 : index
    %4 = vector.load %arg1[%c104, %c0_4] : memref<136x32xf32, #tpu.memory_space<vmem>>, vector<32x32xf32>
    %c0_5 = arith.constant 0 : index
    %c0_6 = arith.constant 0 : index
    %5 = vector.load %arg2[%c0_5, %c0_6] : memref<3x32xf32, #tpu.memory_space<vmem>>, vector<1x32xf32>
    %c1 = arith.constant 1 : index
    %c0_7 = arith.constant 0 : index
    %6 = vector.load %arg2[%c1, %c0_7] : memref<3x32xf32, #tpu.memory_space<vmem>>, vector<1x32xf32>
    %7 = vector.shape_cast %6 : vector<1x32xf32> to vector<1x32xf32>
    %8 = vector.broadcast %7 : vector<1x32xf32> to vector<2x32xf32>
    %c2 = arith.constant 2 : index
    %c0_8 = arith.constant 0 : index
    %9 = vector.load %arg2[%c2, %c0_8] : memref<3x32xf32, #tpu.memory_space<vmem>>, vector<1x32xf32>
    %c0_9 = arith.constant 0 : index
    %c0_10 = arith.constant 0 : index
    %10 = vector.load %arg0[%c0_9, %c0_10] : memref<16x8xf32, #tpu.memory_space<vmem>>, vector<16x8xf32>
    %cst = arith.constant dense<0.000000e+00> : vector<16x32xf32>
    %11 = tpu.matmul %10, %0, %cst {dimension_numbers = #tpu.dot_dimension_numbers<[1], [0], [0], [1], [0, 0, 1, 1], [], []>} : vector<16x8xf32>, vector<8x32xf32>, vector<16x32xf32> -> vector<16x32xf32>
    %12 = vector.broadcast %5 : vector<1x32xf32> to vector<16x32xf32>
    %13 = arith.addf %11, %12 : vector<16x32xf32>
    %cst_11 = arith.constant 0.000000e+00 : f32
    %14 = vector.broadcast %cst_11 : f32 to vector<2x32xf32>
    %cst_12 = arith.constant 0.000000e+00 : f32
    %15 = vector.broadcast %cst_12 : f32 to vector<2x32xf32>
    %cst_13 = arith.constant dense<0.000000e+00> : vector<2x32xf32>
    %16 = tpu.matmul %15, %3, %cst_13 {dimension_numbers = #tpu.dot_dimension_numbers<[1], [0], [0], [1], [0, 0, 1, 1], [], []>} : vector<2x32xf32>, vector<32x32xf32>, vector<2x32xf32> -> vector<2x32xf32>
    %17 = arith.addf %16, %8 : vector<2x32xf32>
    %18 = vector.extract_strided_slice %13 {offsets = [0, 0], sizes = [2, 32], strides = [1, 1]} : vector<16x32xf32> to vector<2x32xf32>
    %cst_14 = arith.constant dense<0.000000e+00> : vector<2x32xf32>
    %19 = tpu.matmul %14, %1, %cst_14 {dimension_numbers = #tpu.dot_dimension_numbers<[1], [0], [0], [1], [0, 0, 1, 1], [], []>} : vector<2x32xf32>, vector<32x32xf32>, vector<2x32xf32> -> vector<2x32xf32>
    %20 = arith.addf %18, %19 : vector<2x32xf32>
    %21 = math.tanh %20 : vector<2x32xf32>
    %cst_15 = arith.constant dense<0.000000e+00> : vector<2x32xf32>
    %22 = tpu.matmul %21, %2, %cst_15 {dimension_numbers = #tpu.dot_dimension_numbers<[1], [0], [0], [1], [0, 0, 1, 1], [], []>} : vector<2x32xf32>, vector<32x32xf32>, vector<2x32xf32> -> vector<2x32xf32>
    %23 = arith.addf %22, %17 : vector<2x32xf32>
    %24 = math.tanh %23 : vector<2x32xf32>
    %cst_16 = arith.constant dense<0.000000e+00> : vector<2x32xf32>
    %25 = tpu.matmul %24, %3, %cst_16 {dimension_numbers = #tpu.dot_dimension_numbers<[1], [0], [0], [1], [0, 0, 1, 1], [], []>} : vector<2x32xf32>, vector<32x32xf32>, vector<2x32xf32> -> vector<2x32xf32>
    %26 = arith.addf %25, %8 : vector<2x32xf32>
    %27 = vector.extract_strided_slice %13 {offsets = [2, 0], sizes = [2, 32], strides = [1, 1]} : vector<16x32xf32> to vector<2x32xf32>
    %cst_17 = arith.constant dense<0.000000e+00> : vector<2x32xf32>
    %28 = tpu.matmul %21, %1, %cst_17 {dimension_numbers = #tpu.dot_dimension_numbers<[1], [0], [0], [1], [0, 0, 1, 1], [], []>} : vector<2x32xf32>, vector<32x32xf32>, vector<2x32xf32> -> vector<2x32xf32>
    %29 = arith.addf %27, %28 : vector<2x32xf32>
    %30 = math.tanh %29 : vector<2x32xf32>
    %cst_18 = arith.constant dense<0.000000e+00> : vector<2x32xf32>
    %31 = tpu.matmul %30, %2, %cst_18 {dimension_numbers = #tpu.dot_dimension_numbers<[1], [0], [0], [1], [0, 0, 1, 1], [], []>} : vector<2x32xf32>, vector<32x32xf32>, vector<2x32xf32> -> vector<2x32xf32>
    %32 = arith.addf %31, %26 : vector<2x32xf32>
    %33 = math.tanh %32 : vector<2x32xf32>
    %cst_19 = arith.constant dense<0.000000e+00> : vector<2x32xf32>
    %34 = tpu.matmul %33, %3, %cst_19 {dimension_numbers = #tpu.dot_dimension_numbers<[1], [0], [0], [1], [0, 0, 1, 1], [], []>} : vector<2x32xf32>, vector<32x32xf32>, vector<2x32xf32> -> vector<2x32xf32>
    %35 = arith.addf %34, %8 : vector<2x32xf32>
    %36 = vector.extract_strided_slice %13 {offsets = [4, 0], sizes = [2, 32], strides = [1, 1]} : vector<16x32xf32> to vector<2x32xf32>
    %cst_20 = arith.constant dense<0.000000e+00> : vector<2x32xf32>
    %37 = tpu.matmul %30, %1, %cst_20 {dimension_numbers = #tpu.dot_dimension_numbers<[1], [0], [0], [1], [0, 0, 1, 1], [], []>} : vector<2x32xf32>, vector<32x32xf32>, vector<2x32xf32> -> vector<2x32xf32>
    %38 = arith.addf %36, %37 : vector<2x32xf32>
    %39 = math.tanh %38 : vector<2x32xf32>
    %cst_21 = arith.constant dense<0.000000e+00> : vector<2x32xf32>
    %40 = tpu.matmul %39, %2, %cst_21 {dimension_numbers = #tpu.dot_dimension_numbers<[1], [0], [0], [1], [0, 0, 1, 1], [], []>} : vector<2x32xf32>, vector<32x32xf32>, vector<2x32xf32> -> vector<2x32xf32>
    %41 = arith.addf %40, %35 : vector<2x32xf32>
    %42 = math.tanh %41 : vector<2x32xf32>
    %cst_22 = arith.constant dense<0.000000e+00> : vector<2x32xf32>
    %43 = tpu.matmul %42, %3, %cst_22 {dimension_numbers = #tpu.dot_dimension_numbers<[1], [0], [0], [1], [0, 0, 1, 1], [], []>} : vector<2x32xf32>, vector<32x32xf32>, vector<2x32xf32> -> vector<2x32xf32>
    %44 = arith.addf %43, %8 : vector<2x32xf32>
    %45 = vector.extract_strided_slice %13 {offsets = [6, 0], sizes = [2, 32], strides = [1, 1]} : vector<16x32xf32> to vector<2x32xf32>
    %cst_23 = arith.constant dense<0.000000e+00> : vector<2x32xf32>
    %46 = tpu.matmul %39, %1, %cst_23 {dimension_numbers = #tpu.dot_dimension_numbers<[1], [0], [0], [1], [0, 0, 1, 1], [], []>} : vector<2x32xf32>, vector<32x32xf32>, vector<2x32xf32> -> vector<2x32xf32>
    %47 = arith.addf %45, %46 : vector<2x32xf32>
    %48 = math.tanh %47 : vector<2x32xf32>
    %cst_24 = arith.constant dense<0.000000e+00> : vector<2x32xf32>
    %49 = tpu.matmul %48, %2, %cst_24 {dimension_numbers = #tpu.dot_dimension_numbers<[1], [0], [0], [1], [0, 0, 1, 1], [], []>} : vector<2x32xf32>, vector<32x32xf32>, vector<2x32xf32> -> vector<2x32xf32>
    %50 = arith.addf %49, %44 : vector<2x32xf32>
    %51 = math.tanh %50 : vector<2x32xf32>
    %cst_25 = arith.constant dense<0.000000e+00> : vector<2x32xf32>
    %52 = tpu.matmul %51, %3, %cst_25 {dimension_numbers = #tpu.dot_dimension_numbers<[1], [0], [0], [1], [0, 0, 1, 1], [], []>} : vector<2x32xf32>, vector<32x32xf32>, vector<2x32xf32> -> vector<2x32xf32>
    %53 = arith.addf %52, %8 : vector<2x32xf32>
    %54 = vector.extract_strided_slice %13 {offsets = [8, 0], sizes = [2, 32], strides = [1, 1]} : vector<16x32xf32> to vector<2x32xf32>
    %cst_26 = arith.constant dense<0.000000e+00> : vector<2x32xf32>
    %55 = tpu.matmul %48, %1, %cst_26 {dimension_numbers = #tpu.dot_dimension_numbers<[1], [0], [0], [1], [0, 0, 1, 1], [], []>} : vector<2x32xf32>, vector<32x32xf32>, vector<2x32xf32> -> vector<2x32xf32>
    %56 = arith.addf %54, %55 : vector<2x32xf32>
    %57 = math.tanh %56 : vector<2x32xf32>
    %cst_27 = arith.constant dense<0.000000e+00> : vector<2x32xf32>
    %58 = tpu.matmul %57, %2, %cst_27 {dimension_numbers = #tpu.dot_dimension_numbers<[1], [0], [0], [1], [0, 0, 1, 1], [], []>} : vector<2x32xf32>, vector<32x32xf32>, vector<2x32xf32> -> vector<2x32xf32>
    %59 = arith.addf %58, %53 : vector<2x32xf32>
    %60 = math.tanh %59 : vector<2x32xf32>
    %cst_28 = arith.constant dense<0.000000e+00> : vector<2x32xf32>
    %61 = tpu.matmul %60, %3, %cst_28 {dimension_numbers = #tpu.dot_dimension_numbers<[1], [0], [0], [1], [0, 0, 1, 1], [], []>} : vector<2x32xf32>, vector<32x32xf32>, vector<2x32xf32> -> vector<2x32xf32>
    %62 = arith.addf %61, %8 : vector<2x32xf32>
    %63 = vector.extract_strided_slice %13 {offsets = [10, 0], sizes = [2, 32], strides = [1, 1]} : vector<16x32xf32> to vector<2x32xf32>
    %cst_29 = arith.constant dense<0.000000e+00> : vector<2x32xf32>
    %64 = tpu.matmul %57, %1, %cst_29 {dimension_numbers = #tpu.dot_dimension_numbers<[1], [0], [0], [1], [0, 0, 1, 1], [], []>} : vector<2x32xf32>, vector<32x32xf32>, vector<2x32xf32> -> vector<2x32xf32>
    %65 = arith.addf %63, %64 : vector<2x32xf32>
    %66 = math.tanh %65 : vector<2x32xf32>
    %cst_30 = arith.constant dense<0.000000e+00> : vector<2x32xf32>
    %67 = tpu.matmul %66, %2, %cst_30 {dimension_numbers = #tpu.dot_dimension_numbers<[1], [0], [0], [1], [0, 0, 1, 1], [], []>} : vector<2x32xf32>, vector<32x32xf32>, vector<2x32xf32> -> vector<2x32xf32>
    %68 = arith.addf %67, %62 : vector<2x32xf32>
    %69 = math.tanh %68 : vector<2x32xf32>
    %cst_31 = arith.constant dense<0.000000e+00> : vector<2x32xf32>
    %70 = tpu.matmul %69, %3, %cst_31 {dimension_numbers = #tpu.dot_dimension_numbers<[1], [0], [0], [1], [0, 0, 1, 1], [], []>} : vector<2x32xf32>, vector<32x32xf32>, vector<2x32xf32> -> vector<2x32xf32>
    %71 = arith.addf %70, %8 : vector<2x32xf32>
    %72 = vector.extract_strided_slice %13 {offsets = [12, 0], sizes = [2, 32], strides = [1, 1]} : vector<16x32xf32> to vector<2x32xf32>
    %cst_32 = arith.constant dense<0.000000e+00> : vector<2x32xf32>
    %73 = tpu.matmul %66, %1, %cst_32 {dimension_numbers = #tpu.dot_dimension_numbers<[1], [0], [0], [1], [0, 0, 1, 1], [], []>} : vector<2x32xf32>, vector<32x32xf32>, vector<2x32xf32> -> vector<2x32xf32>
    %74 = arith.addf %72, %73 : vector<2x32xf32>
    %75 = math.tanh %74 : vector<2x32xf32>
    %cst_33 = arith.constant dense<0.000000e+00> : vector<2x32xf32>
    %76 = tpu.matmul %75, %2, %cst_33 {dimension_numbers = #tpu.dot_dimension_numbers<[1], [0], [0], [1], [0, 0, 1, 1], [], []>} : vector<2x32xf32>, vector<32x32xf32>, vector<2x32xf32> -> vector<2x32xf32>
    %77 = arith.addf %76, %71 : vector<2x32xf32>
    %78 = math.tanh %77 : vector<2x32xf32>
    %cst_34 = arith.constant dense<0.000000e+00> : vector<2x32xf32>
    %79 = tpu.matmul %78, %3, %cst_34 {dimension_numbers = #tpu.dot_dimension_numbers<[1], [0], [0], [1], [0, 0, 1, 1], [], []>} : vector<2x32xf32>, vector<32x32xf32>, vector<2x32xf32> -> vector<2x32xf32>
    %80 = arith.addf %79, %8 : vector<2x32xf32>
    %81 = vector.extract_strided_slice %13 {offsets = [14, 0], sizes = [2, 32], strides = [1, 1]} : vector<16x32xf32> to vector<2x32xf32>
    %cst_35 = arith.constant dense<0.000000e+00> : vector<2x32xf32>
    %82 = tpu.matmul %75, %1, %cst_35 {dimension_numbers = #tpu.dot_dimension_numbers<[1], [0], [0], [1], [0, 0, 1, 1], [], []>} : vector<2x32xf32>, vector<32x32xf32>, vector<2x32xf32> -> vector<2x32xf32>
    %83 = arith.addf %81, %82 : vector<2x32xf32>
    %84 = math.tanh %83 : vector<2x32xf32>
    %cst_36 = arith.constant dense<0.000000e+00> : vector<2x32xf32>
    %85 = tpu.matmul %84, %2, %cst_36 {dimension_numbers = #tpu.dot_dimension_numbers<[1], [0], [0], [1], [0, 0, 1, 1], [], []>} : vector<2x32xf32>, vector<32x32xf32>, vector<2x32xf32> -> vector<2x32xf32>
    %86 = arith.addf %85, %80 : vector<2x32xf32>
    %87 = math.tanh %86 : vector<2x32xf32>
    %cst_37 = arith.constant dense<0.000000e+00> : vector<2x32xf32>
    %88 = tpu.matmul %87, %4, %cst_37 {dimension_numbers = #tpu.dot_dimension_numbers<[1], [0], [0], [1], [0, 0, 1, 1], [], []>} : vector<2x32xf32>, vector<32x32xf32>, vector<2x32xf32> -> vector<2x32xf32>
    %89 = vector.broadcast %9 : vector<1x32xf32> to vector<2x32xf32>
    %90 = arith.addf %88, %89 : vector<2x32xf32>
    %91 = math.tanh %90 : vector<2x32xf32>
    %92 = vector.extract_strided_slice %91 {offsets = [0, 0], sizes = [2, 2], strides = [1, 1]} : vector<2x32xf32> to vector<2x2xf32>
    %c0_38 = arith.constant 0 : index
    %c0_39 = arith.constant 0 : index
    %93 = vector.load %arg3[%c0_38, %c0_39] : memref<2x2xf32, #tpu.memory_space<vmem>>, vector<2x2xf32>
    tpu.vector_store %arg3[%c0_38, %c0_39], %92 {strides = array<i32>} : memref<2x2xf32, #tpu.memory_space<vmem>>, vector<2x2xf32>,
    return
  }
}

</mosaic_0001>

<bundles_post_ra>
// kernel: rnn_model_forward.1
= control target key start
LH: loop header
LB: loop body
LE: loop exit
PB: predicated region body
PF: predicated region fallthrough
CT: control target
= control target key end

     0   :  { %vm45_vm0 = vcmask 64512   ;;  %v2670_v8 = vmov 0.0|0.0   ;;  %s2979_s0 = inlined_call_operand.vmem [shape: f32[16,8], index: 0, kind: input, shape index: {}]   ;;  %s2980_s1 = inlined_call_operand.vmem [shape: f32[136,32], index: 1, kind: input, shape index: {}]   ;;  %s2981_s2 = inlined_call_operand.vmem [shape: f32[3,32], index: 2, kind: input, shape index: {}]   ;;  %s2982_s3 = inlined_call_operand.hbm [shape: f32[2,2], index: 3, kind: output, shape index: {}]  }
   0x1   :  { %v15_v0 = vld [vmem:[%s2980_s1] sm:$0xff]  ;;  %v40_v2 = vld [vmem:[%s2979_s0 + $0x8] sm:$0xff]  ;;  %v17_v4 = vld [vmem:[%s2980_s1 + $0x10] sm:$0xff]  ;;  %2434 = vmatprep.subr.bf16.mxu1 %v2670_v8 }
   0x2   :  { %v39_v1 = vld [vmem:[%s2979_s0] sm:$0xff]  ;;  %2154 = vmatprep.subr.mxu0 %v15_v0  ;;  %v16_v3 = vld [vmem:[%s2980_s1 + $0x8] sm:$0xff]  ;;  %v18_v5 = vld [vmem:[%s2980_s1 + $0x18] sm:$0xff] }
   0x3   :  { %2156 = vmatprep.mubr.msk.f32.mxu0 %vm45_vm0, %v39_v1  ;;  %2155 = vmatpush3.msra.mxu0 %v15_v0  ;;  %v2712_v6 = vpack.c.bf16 %v17_v4, %v16_v3  ;;  %v19_v7 = vld [vmem:[%s2980_s1 + $0x20] sm:$0xff] }
   0x4   :  { %8 = vsyncpa [#allocation3], 0  ;;  %2157 = vmatmul.mubr.msk.f32.vlgmr.msra.gmra.mrb[0].mxu0 %vm45_vm0, %v40_v2  ;;  %2440 = vmatprep.subr.bf16.mxu0 %v2670_v8  ;;  %v2720_v9 = vpack.c.bf16 %v19_v7, %v18_v5  ;;  %vm2671_vm1 = vmmov 0   ;;  %v2672_v10 = vmov 0.0   ;;  %v24_v11 = vld [vmem:[%s2980_s1 + $0x48] sm:$0xff]  ;;  %v25_v12 = vld [vmem:[%s2980_s1 + $0x50] sm:$0xff] }
   0x5   :  { %2442 = vmatpush3.bf16.msra.mxu0 %v2712_v6  ;;  %2178 = vmatprep.mubr.msk.f32.mxu0 %vm2671_vm1, %v2672_v10  ;;  %v2738_v13 = vpack.c.bf16 %v25_v12, %v24_v11  ;;  %v26_v14 = vld [vmem:[%s2980_s1 + $0x58] sm:$0xff]  ;;  %v27_v15 = vld [vmem:[%s2980_s1 + $0x60] sm:$0xff]  ;;  %v20_v17 = vld [vmem:[%s2980_s1 + $0x28] sm:$0xff]  ;;  %vm127_vm2 = vcmask 261120   ;;  %vm1982_vm3 = vcmask 9216  }
   0x6   :  { %2443 = vmatprep.subr.bf16.mxu0 %v2670_v8  ;;  %2167 = vmatprep.mubr.msk.f32.mxu1 %vm2671_vm1, %v2672_v10  ;;  %v2750_v16 = vpack.c.bf16 %v27_v15, %v26_v14  ;;  %v21_v18 = vld [vmem:[%s2980_s1 + $0x30] sm:$0xff]  ;;  %v22_v19 = vld [vmem:[%s2980_s1 + $0x38] sm:$0xff]  ;;  %v23_v21 = vld [vmem:[%s2980_s1 + $0x40] sm:$0xff] }
   0x7   :  { %2436 = vmatpush3.bf16.msra.mxu1 %v2738_v13  ;;  %v2765_v20 = vpack.c.bf16 %v21_v18, %v20_v17  ;;  %v2772_v22 = vpack.c.bf16 %v23_v21, %v22_v19  ;;  %v1999_v23 = vld [vmem:[%s2981_s2] ss:$0 sm:$0xff]  ;;  %v2804_v32 = vld [vmem:[%s2981_s2 + $0x1] ss:$0 sm:$0xff] }
   0x8   :  { %2437 = vmatprep.subr.bf16.mxu1 %v2670_v8 }
   0x9   :  { %2445 = vmatpush3.bf16.msra.mxu0 %v2720_v9 }
   0xa   :  { %2452 = vmatprep.subr.bf16.mxu0 %v2670_v8 }
   0xb   :  { %2439 = vmatpush3.bf16.msra.mxu1 %v2750_v16 }
   0xc   :  { %2179 = vmatmul.mubr.f32.vlgmr.msra.gmra.mrb[2].mxu0 %v2672_v10  ;;  %2446 = vmatprep.subr.bf16.mxu1 %v2670_v8 }
   0xd   :  { %2200 = vmatprep.mubr.msk.f32.mxu0 %vm2671_vm1, %v2672_v10  ;;  %2454 = vmatpush3.bf16.msra.mxu0 %v2738_v13 }
   0xe   :  { %2455 = vmatprep.subr.bf16.mxu0 %v2670_v8  ;;  %2168 = vmatmul.mubr.f32.vlgmr.msra.gmra.mrb[0].mxu1 %v2672_v10 }
   0xf   :  { %2448 = vmatpush3.bf16.msra.mxu1 %v2765_v20  ;;  %2189 = vmatprep.mubr.msk.f32.mxu1 %vm2671_vm1, %v2672_v10 }
  0x10   :  { %2449 = vmatprep.subr.bf16.mxu1 %v2670_v8 }
  0x11   :  { %2457 = vmatpush3.bf16.msra.mxu0 %v2750_v16 }
  0x12   :  { %2464 = vmatprep.subr.bf16.mxu0 %v2670_v8 }
  0x13   :  { %2451 = vmatpush3.bf16.msra.mxu1 %v2772_v22 }
  0x14   :  { %2458 = vmatprep.subr.bf16.mxu1 %v2670_v8 }
  0xd7   :  { %v2158_v24 = vpop.f32.mrb[0].mxu0 }
  0xd8   :  { %v2782_v25 = vadd.f32 %v2158_v24, %v1999_v23  ;;  %v118_v26 = vpop.f32.mrb[1].mxu0 }
  0xd9   :  { %v2784_v27 = vadd.f32 %v1999_v23, %v118_v26 }
  0xdf   :  { %v267_v28 = vpop.f32.mrb[2].mxu0 }
  0xe0   :  { %v271_v29 = vadd.f32 %v267_v28, %v2784_v27  ;;  %v2180_v30 = vpop.f32.mrb[3].mxu0 }
  0xe2   :  { %2612 = vtanh.f32 %v271_v29 }
  0xec   :  { %v2613_v31 = vpop.eup %2612 }
  0xed   :  { %2190 = vmatmul.mubr.msk.f32.vlgmr.msra.gmra.mrb[0].mxu1 %vm127_vm2, %v2613_v31 }
  0xee   :  { %2460 = vmatpush3.bf16.msra.mxu1 %v2712_v6  ;;  %2211 = vmatprep.mubr.msk.f32.mxu1 %vm2671_vm1, %v2672_v10 }
  0xef   :  { %2461 = vmatprep.subr.bf16.mxu1 %v2670_v8 }
  0xf2   :  { %2463 = vmatpush3.bf16.msra.mxu1 %v2720_v9 }
  0xf3   :  { %2470 = vmatprep.subr.bf16.mxu1 %v2670_v8 }
  0xf5   :  { %2212 = vmatmul.mubr.msk.f32.vlgmr.msra.gmra.mrb[2].mxu1 %vm127_vm2, %v2613_v31 }
  0xf6   :  { %2472 = vmatpush3.bf16.msra.mxu1 %v2738_v13  ;;  %2233 = vmatprep.mubr.msk.f32.mxu1 %vm2671_vm1, %v2672_v10 }
  0xf7   :  { %2473 = vmatprep.subr.bf16.mxu1 %v2670_v8 }
  0xfa   :  { %2475 = vmatpush3.bf16.msra.mxu1 %v2750_v16 }
  0xfb   :  { %2482 = vmatprep.subr.bf16.mxu1 %v2670_v8 }
 0x1c0   :  { %v342_v33 = vpop.f32.mrb[0].mxu1 }
 0x1c1   :  { %v2584_v34 = vadd.f32 %v2804_v32, %v342_v33  ;;  %v2191_v35 = vpop.f32.mrb[1].mxu1 }
 0x1c3   :  { %2614 = vtanh.f32 %v2584_v34 }
 0x1c8   :  { %v486_v36 = vpop.f32.mrb[2].mxu1 }
 0x1c9   :  { %v491_v37 = vrot.slane %v486_v36, 6  ;;  %v2213_v38 = vpop.f32.mrb[3].mxu1 }
 0x1cb   :  { %v493_v39 = vadd.f32 %v491_v37, %v2784_v27 }
 0x1cd   :  { %v2615_v40 = vpop.eup %2614  ;;  %2616 = vtanh.f32 %v493_v39 }
 0x1ce   :  { %2201 = vmatmul.mubr.msk.f32.vlgmr.msra.gmra.mrb[4].mxu0 %vm127_vm2, %v2615_v40 }
 0x1cf   :  { %2466 = vmatpush3.bf16.msra.mxu0 %v2765_v20  ;;  %2222 = vmatprep.mubr.msk.f32.mxu0 %vm2671_vm1, %v2672_v10 }
 0x1d0   :  { %2467 = vmatprep.subr.bf16.mxu0 %v2670_v8 }
 0x1d3   :  { %2469 = vmatpush3.bf16.msra.mxu0 %v2772_v22 }
 0x1d4   :  { %2476 = vmatprep.subr.bf16.mxu0 %v2670_v8 }
 0x1d7   :  { %v2617_v41 = vpop.eup %2616 }
 0x1d8   :  { %v496_v42 = vrot.slane %v2617_v41, 2 }
 0x1da   :  { %2223 = vmatmul.mubr.msk.f32.vlgmr.msra.gmra.mrb[4].mxu0 %vm127_vm2, %v496_v42 }
 0x1db   :  { %2478 = vmatpush3.bf16.msra.mxu0 %v2712_v6  ;;  %2244 = vmatprep.mubr.msk.f32.mxu0 %vm2671_vm1, %v2672_v10 }
 0x1dc   :  { %2479 = vmatprep.subr.bf16.mxu0 %v2670_v8 }
 0x1df   :  { %2481 = vmatpush3.bf16.msra.mxu0 %v2720_v9 }
 0x1e0   :  { %2488 = vmatprep.subr.bf16.mxu0 %v2670_v8 }
 0x1e2   :  { %2245 = vmatmul.mubr.msk.f32.vlgmr.msra.gmra.mrb[6].mxu0 %vm127_vm2, %v496_v42 }
 0x1e3   :  { %2490 = vmatpush3.bf16.msra.mxu0 %v2738_v13  ;;  %2266 = vmatprep.mubr.msk.f32.mxu0 %vm2671_vm1, %v2672_v10 }
 0x1e4   :  { %2491 = vmatprep.subr.bf16.mxu0 %v2670_v8 }
 0x1e7   :  { %2493 = vmatpush3.bf16.msra.mxu0 %v2750_v16 }
 0x1e8   :  { %2500 = vmatprep.subr.bf16.mxu0 %v2670_v8 }
 0x2ad   :  { %v565_v43 = vpop.f32.mrb[4].mxu0 }
 0x2ae   :  { %v2585_v44 = vadd.f32 %v2804_v32, %v565_v43  ;;  %v2224_v45 = vpop.f32.mrb[5].mxu0  ;;  %v29_v43 = vld [vmem:[%s2980_s1 + $0x70] sm:$0xff] }
 0x2b0   :  { %2618 = vtanh.f32 %v2585_v44 }
 0x2b5   :  { %v709_v46 = vpop.f32.mrb[6].mxu0 }
 0x2b6   :  { %v714_v47 = vrot.slane %v709_v46, 4  ;;  %v2246_v48 = vpop.f32.mrb[7].mxu0 }
 0x2b8   :  { %v716_v49 = vadd.f32 %v714_v47, %v2784_v27 }
 0x2ba   :  { %v2619_v50 = vpop.eup %2618  ;;  %2620 = vtanh.f32 %v716_v49  ;;  %v2024_v49 = vld [vmem:[%s2981_s2 + $0x2] ss:$0 sm:$0xff] }
 0x2bb   :  { %2234 = vmatmul.mubr.msk.f32.vlgmr.msra.gmra.mrb[4].mxu1 %vm127_vm2, %v2619_v50 }
 0x2bc   :  { %2484 = vmatpush3.bf16.msra.mxu1 %v2765_v20  ;;  %2255 = vmatprep.mubr.msk.f32.mxu1 %vm2671_vm1, %v2672_v10 }
 0x2bd   :  { %2485 = vmatprep.subr.bf16.mxu1 %v2670_v8 }
 0x2c0   :  { %2487 = vmatpush3.bf16.msra.mxu1 %v2772_v22 }
 0x2c1   :  { %2494 = vmatprep.subr.bf16.mxu1 %v2670_v8 }
 0x2c4   :  { %v2621_v51 = vpop.eup %2620 }
 0x2c5   :  { %v719_v52 = vrot.slane %v2621_v51, 4 }
 0x2c7   :  { %2256 = vmatmul.mubr.msk.f32.vlgmr.msra.gmra.mrb[4].mxu1 %vm127_vm2, %v719_v52 }
 0x2c8   :  { %2496 = vmatpush3.bf16.msra.mxu1 %v2712_v6  ;;  %2277 = vmatprep.mubr.msk.f32.mxu1 %vm2671_vm1, %v2672_v10 }
 0x2c9   :  { %2497 = vmatprep.subr.bf16.mxu1 %v2670_v8 }
 0x2cc   :  { %2499 = vmatpush3.bf16.msra.mxu1 %v2720_v9 }
 0x2cd   :  { %2506 = vmatprep.subr.bf16.mxu1 %v2670_v8 }
 0x2cf   :  { %2278 = vmatmul.mubr.msk.f32.vlgmr.msra.gmra.mrb[6].mxu1 %vm127_vm2, %v719_v52 }
 0x2d0   :  { %2508 = vmatpush3.bf16.msra.mxu1 %v2738_v13  ;;  %2299 = vmatprep.mubr.msk.f32.mxu1 %vm2671_vm1, %v2672_v10 }
 0x2d1   :  { %2509 = vmatprep.subr.bf16.mxu1 %v2670_v8 }
 0x2d4   :  { %2511 = vmatpush3.bf16.msra.mxu1 %v2750_v16 }
 0x2d5   :  { %2518 = vmatprep.subr.bf16.mxu1 %v2670_v8 }
 0x39a   :  { %v788_v53 = vpop.f32.mrb[4].mxu1 }
 0x39b   :  { %v2586_v54 = vadd.f32 %v2804_v32, %v788_v53  ;;  %v2257_v55 = vpop.f32.mrb[5].mxu1 }
 0x39d   :  { %2622 = vtanh.f32 %v2586_v54 }
 0x3a2   :  { %v932_v56 = vpop.f32.mrb[6].mxu1 }
 0x3a3   :  { %v937_v57 = vrot.slane %v932_v56, 2  ;;  %v2279_v58 = vpop.f32.mrb[7].mxu1 }
 0x3a5   :  { %v939_v59 = vadd.f32 %v937_v57, %v2784_v27 }
 0x3a7   :  { %v2623_v60 = vpop.eup %2622  ;;  %2624 = vtanh.f32 %v939_v59 }
 0x3a8   :  { %2267 = vmatmul.mubr.msk.f32.vlgmr.msra.gmra.mrb[8].mxu0 %vm127_vm2, %v2623_v60 }
 0x3a9   :  { %2502 = vmatpush3.bf16.msra.mxu0 %v2765_v20  ;;  %2288 = vmatprep.mubr.msk.f32.mxu0 %vm2671_vm1, %v2672_v10 }
 0x3aa   :  { %2503 = vmatprep.subr.bf16.mxu0 %v2670_v8 }
 0x3ad   :  { %2505 = vmatpush3.bf16.msra.mxu0 %v2772_v22 }
 0x3ae   :  { %2512 = vmatprep.subr.bf16.mxu0 %v2670_v8 }
 0x3b1   :  { %v2625_v61 = vpop.eup %2624 }
 0x3b2   :  { %v942_v62 = vrot.slane %v2625_v61, 6 }
 0x3b4   :  { %2289 = vmatmul.mubr.msk.f32.vlgmr.msra.gmra.mrb[8].mxu0 %vm127_vm2, %v942_v62 }
 0x3b5   :  { %2514 = vmatpush3.bf16.msra.mxu0 %v2712_v6  ;;  %2310 = vmatprep.mubr.msk.f32.mxu0 %vm2671_vm1, %v2672_v10 }
 0x3b6   :  { %2515 = vmatprep.subr.bf16.mxu0 %v2670_v8 }
 0x3b9   :  { %2517 = vmatpush3.bf16.msra.mxu0 %v2720_v9 }
 0x3ba   :  { %2524 = vmatprep.subr.bf16.mxu0 %v2670_v8 }
 0x3bc   :  { %2311 = vmatmul.mubr.msk.f32.vlgmr.msra.gmra.mrb[10].mxu0 %vm127_vm2, %v942_v62 }
 0x3bd   :  { %2526 = vmatpush3.bf16.msra.mxu0 %v2738_v13  ;;  %2332 = vmatprep.mubr.msk.f32.mxu0 %vm2671_vm1, %v2672_v10 }
 0x3be   :  { %2527 = vmatprep.subr.bf16.mxu0 %v2670_v8 }
 0x3c1   :  { %2529 = vmatpush3.bf16.msra.mxu0 %v2750_v16 }
 0x3c2   :  { %2536 = vmatprep.subr.bf16.mxu0 %v2670_v8 }
 0x487   :  { %v1011_v63 = vpop.f32.mrb[8].mxu0 }
 0x488   :  { %v2587_v0 = vadd.f32 %v2804_v32, %v1011_v63  ;;  %v2290_v1 = vpop.f32.mrb[9].mxu0 }
 0x48a   :  { %2626 = vtanh.f32 %v2587_v0 }
 0x48f   :  { %v1155_v2 = vpop.f32.mrb[10].mxu0 }
 0x490   :  { %v1159_v3 = vadd.f32 %v1155_v2, %v2782_v25  ;;  %v2312_v4 = vpop.f32.mrb[11].mxu0 }
 0x492   :  { %2628 = vtanh.f32 %v1159_v3 }
 0x494   :  { %v2627_v5 = vpop.eup %2626 }
 0x495   :  { %2300 = vmatmul.mubr.msk.f32.vlgmr.msra.gmra.mrb[8].mxu1 %vm127_vm2, %v2627_v5 }
 0x496   :  { %2520 = vmatpush3.bf16.msra.mxu1 %v2765_v20  ;;  %2321 = vmatprep.mubr.msk.f32.mxu1 %vm2671_vm1, %v2672_v10 }
 0x497   :  { %2521 = vmatprep.subr.bf16.mxu1 %v2670_v8 }
 0x49a   :  { %2523 = vmatpush3.bf16.msra.mxu1 %v2772_v22 }
 0x49b   :  { %2530 = vmatprep.subr.bf16.mxu1 %v2670_v8 }
 0x49c   :  { %v2629_v7 = vpop.eup %2628 }
 0x49d   :  { %2322 = vmatmul.mubr.msk.f32.vlgmr.msra.gmra.mrb[8].mxu1 %vm127_vm2, %v2629_v7 }
 0x49e   :  { %2532 = vmatpush3.bf16.msra.mxu1 %v2712_v6  ;;  %2343 = vmatprep.mubr.msk.f32.mxu1 %vm2671_vm1, %v2672_v10 }
 0x49f   :  { %2533 = vmatprep.subr.bf16.mxu1 %v2670_v8 }
 0x4a2   :  { %2535 = vmatpush3.bf16.msra.mxu1 %v2720_v9 }
 0x4a3   :  { %2542 = vmatprep.subr.bf16.mxu1 %v2670_v8 }
 0x4a5   :  { %2344 = vmatmul.mubr.msk.f32.vlgmr.msra.gmra.mrb[10].mxu1 %vm127_vm2, %v2629_v7 }
 0x4a6   :  { %2544 = vmatpush3.bf16.msra.mxu1 %v2738_v13  ;;  %2365 = vmatprep.mubr.msk.f32.mxu1 %vm2671_vm1, %v2672_v10 }
 0x4a7   :  { %2545 = vmatprep.subr.bf16.mxu1 %v2670_v8 }
 0x4aa   :  { %2547 = vmatpush3.bf16.msra.mxu1 %v2750_v16 }
 0x4ab   :  { %2554 = vmatprep.subr.bf16.mxu1 %v2670_v8 }
 0x570   :  { %v1230_v11 = vpop.f32.mrb[8].mxu1 }
 0x571   :  { %v2588_v12 = vadd.f32 %v2804_v32, %v1230_v11  ;;  %v2323_v14 = vpop.f32.mrb[9].mxu1 }
 0x573   :  { %2630 = vtanh.f32 %v2588_v12 }
 0x578   :  { %v1374_v15 = vpop.f32.mrb[10].mxu1 }
 0x579   :  { %v1379_v17 = vrot.slane %v1374_v15, 6  ;;  %v2345_v18 = vpop.f32.mrb[11].mxu1 }
 0x57b   :  { %v1381_v19 = vadd.f32 %v1379_v17, %v2782_v25 }
 0x57d   :  { %v2631_v21 = vpop.eup %2630  ;;  %2632 = vtanh.f32 %v1381_v19 }
 0x57e   :  { %2333 = vmatmul.mubr.msk.f32.vlgmr.msra.gmra.mrb[12].mxu0 %vm127_vm2, %v2631_v21 }
 0x57f   :  { %2538 = vmatpush3.bf16.msra.mxu0 %v2765_v20  ;;  %2354 = vmatprep.mubr.msk.f32.mxu0 %vm2671_vm1, %v2672_v10 }
 0x580   :  { %2539 = vmatprep.subr.bf16.mxu0 %v2670_v8 }
 0x583   :  { %2541 = vmatpush3.bf16.msra.mxu0 %v2772_v22 }
 0x584   :  { %2548 = vmatprep.subr.bf16.mxu0 %v2670_v8 }
 0x587   :  { %v2633_v23 = vpop.eup %2632 }
 0x588   :  { %v1384_v24 = vrot.slane %v2633_v23, 2 }
 0x58a   :  { %2355 = vmatmul.mubr.msk.f32.vlgmr.msra.gmra.mrb[12].mxu0 %vm127_vm2, %v1384_v24 }
 0x58b   :  { %2550 = vmatpush3.bf16.msra.mxu0 %v2712_v6  ;;  %2376 = vmatprep.mubr.msk.f32.mxu0 %vm2671_vm1, %v2672_v10 }
 0x58c   :  { %2551 = vmatprep.subr.bf16.mxu0 %v2670_v8 }
 0x58f   :  { %2553 = vmatpush3.bf16.msra.mxu0 %v2720_v9 }
 0x590   :  { %2560 = vmatprep.subr.bf16.mxu0 %v2670_v8 }
 0x592   :  { %2377 = vmatmul.mubr.msk.f32.vlgmr.msra.gmra.mrb[14].mxu0 %vm127_vm2, %v1384_v24 }
 0x593   :  { %2562 = vmatpush3.bf16.msra.mxu0 %v2738_v13  ;;  %2398 = vmatprep.mubr.msk.f32.mxu0 %vm2671_vm1, %v2672_v10 }
 0x594   :  { %2563 = vmatprep.subr.bf16.mxu0 %v2670_v8 }
 0x597   :  { %2565 = vmatpush3.bf16.msra.mxu0 %v2750_v16 }
 0x598   :  { %2572 = vmatprep.subr.bf16.mxu0 %v2670_v8 }
 0x65d   :  { %v1453_v26 = vpop.f32.mrb[12].mxu0 }
 0x65e   :  { %v2589_v27 = vadd.f32 %v2804_v32, %v1453_v26  ;;  %v2356_v28 = vpop.f32.mrb[13].mxu0 }
 0x660   :  { %2634 = vtanh.f32 %v2589_v27 }
 0x665   :  { %v1597_v29 = vpop.f32.mrb[14].mxu0 }
 0x666   :  { %v1602_v30 = vrot.slane %v1597_v29, 4  ;;  %v2378_v31 = vpop.f32.mrb[15].mxu0 }
 0x668   :  { %v1604_v33 = vadd.f32 %v1602_v30, %v2782_v25 }
 0x66a   :  { %v2635_v13 = vpop.eup %2634  ;;  %2636 = vtanh.f32 %v1604_v33 }
 0x66b   :  { %2366 = vmatmul.mubr.msk.f32.vlgmr.msra.gmra.mrb[12].mxu1 %vm127_vm2, %v2635_v13 }
 0x66c   :  { %2556 = vmatpush3.bf16.msra.mxu1 %v2765_v20  ;;  %2387 = vmatprep.mubr.msk.f32.mxu1 %vm2671_vm1, %v2672_v10 }
 0x66d   :  { %2557 = vmatprep.subr.bf16.mxu1 %v2670_v8 }
 0x670   :  { %2559 = vmatpush3.bf16.msra.mxu1 %v2772_v22 }
 0x671   :  { %2566 = vmatprep.subr.bf16.mxu1 %v2670_v8 }
 0x674   :  { %v2637_v16 = vpop.eup %2636 }
 0x675   :  { %v1607_v34 = vrot.slane %v2637_v16, 4 }
 0x677   :  { %2388 = vmatmul.mubr.msk.f32.vlgmr.msra.gmra.mrb[12].mxu1 %vm127_vm2, %v1607_v34 }
 0x678   :  { %2568 = vmatpush3.bf16.msra.mxu1 %v2712_v6  ;;  %2409 = vmatprep.mubr.msk.f32.mxu1 %vm2671_vm1, %v2672_v10 }
 0x679   :  { %2569 = vmatprep.subr.bf16.mxu1 %v2670_v8 }
 0x67c   :  { %2571 = vmatpush3.bf16.msra.mxu1 %v2720_v9 }
 0x67d   :  { %2578 = vmatprep.subr.bf16.mxu1 %v2670_v8 }
 0x67f   :  { %2410 = vmatmul.mubr.msk.f32.vlgmr.msra.gmra.mrb[14].mxu1 %vm127_vm2, %v1607_v34 }
 0x680   :  { %2431 = vmatprep.mubr.msk.f32.mxu1 %vm2671_vm1, %v2672_v10 }
 0x74a   :  { %v1676_v35 = vpop.f32.mrb[12].mxu1 }
 0x74b   :  { %v2590_v36 = vadd.f32 %v2804_v32, %v1676_v35  ;;  %v2389_v37 = vpop.f32.mrb[13].mxu1 }
 0x74d   :  { %2638 = vtanh.f32 %v2590_v36 }
 0x752   :  { %v1820_v6 = vpop.f32.mrb[14].mxu1 }
 0x753   :  { %v1825_v38 = vrot.slane %v1820_v6, 2  ;;  %v2411_v39 = vpop.f32.mrb[15].mxu1 }
 0x755   :  { %v1827_v40 = vadd.f32 %v1825_v38, %v2782_v25  ;;  %v28_v25 = vld [vmem:[%s2980_s1 + $0x68] sm:$0xff] }
 0x757   :  { %v2639_v41 = vpop.eup %2638  ;;  %2640 = vtanh.f32 %v1827_v40 }
 0x758   :  { %2399 = vmatmul.mubr.msk.f32.vlgmr.msra.gmra.mrb[16].mxu0 %vm127_vm2, %v2639_v41 }
 0x759   :  { %2574 = vmatpush3.bf16.msra.mxu0 %v2765_v20  ;;  %2420 = vmatprep.mubr.msk.f32.mxu0 %vm2671_vm1, %v2672_v10  ;;  %v30_v10 = vld [vmem:[%s2980_s1 + $0x78] sm:$0xff]  ;;  %v2579_v20 = vpack.c.bf16 %v29_v43, %v28_v25 }
 0x75a   :  { %2575 = vmatprep.subr.bf16.mxu0 %v2670_v8 }
 0x75b   :  { %2580 = vmatpush3.bf16.msra.mxu1 %v2579_v20 }
 0x75c   :  { %2581 = vmatprep.subr.bf16.mxu1 %v2670_v8 }
 0x75d   :  { %2577 = vmatpush3.bf16.msra.mxu0 %v2772_v22  ;;  %v31_v22 = vld [vmem:[%s2980_s1 + $0x80] sm:$0xff]  ;;  %s2673_s1 = smov [#allocation2]  }
 0x75e   :  { %v2582_v44 = vpack.c.bf16 %v31_v22, %v30_v10  ;;  %s1990_s27 = sshll.u32 %s2673_s1, 4  ;;  %s1991_s27 = int_to_ptr.vmem [resolvable:$true] %s1990_s27 }
 0x75f   :  { %s2646_s28 = scalar_lea.vmem %s1991_s27, 32  ;;  %p2651_p1 = scmp.lt.s32.totalorder %s1991_s27, %s1991_s27 }
 0x760   :  { %2583 = vmatpush3.bf16.msra.mxu1 %v2582_v44  ;;  %p2647_p0 = scmp.ne.s32.totalorder %s1991_s27, %s2646_s28  ;;  %p2652_p2 = scmp.lt.s32.totalorder %s2646_s28, %s2646_s28 }
 0x761   :  { %v2641_v9 = vpop.eup %2640 }
 0x762   :  { %v1830_v42 = vrot.slane %v2641_v9, 6  ;;  %p2653_p3 = por %p2652_p2, %p2651_p1 }
 0x764   :  { %2421 = vmatmul.mubr.msk.f32.vlgmr.msra.gmra.mrb[16].mxu0 %vm127_vm2, %v1830_v42  ;;  %p2654_p4 = pnand %p2653_p3, %p2647_p0 }
 0x837   :  { %v1899_v45 = vpop.f32.mrb[16].mxu0 }
 0x838   :  { %v2591_v46 = vadd.f32 %v2804_v32, %v1899_v45  ;;  %v2422_v47 = vpop.f32.mrb[17].mxu0 }
 0x83a   :  { %2642 = vtanh.f32 %v2591_v46 }
 0x844   :  { %v2643_v48 = vpop.eup %2642 }
 0x845   :  { %2432 = vmatmul.mubr.msk.f32.vlgmr.msra.gmra.mrb[16].mxu1 %vm127_vm2, %v2643_v48 }
 0x918   :  { %v1977_v50 = vpop.f32.mrb[16].mxu1 }
 0x919   :  { %v1978_v51 = vadd.f32 %v2024_v49, %v1977_v50  ;;  %v2433_v52 = vpop.f32.mrb[17].mxu1 }
 0x91b   :  { %2644 = vtanh.f32 %v1978_v51 }
 0x925   :  { %v2645_v8 = vpop.eup %2644 }
 0x926   :  { %1983 = vst.msk [vmem:[#allocation2] sm:$0x3] %vm1982_vm3, %v2645_v8 }
 0x927   :  { %2657 = shalt.err (!%p2654_p4)
}
 0x928   :  { %s2658_s2 = scalar_lea.hbm %s2982_s3, 32 }
 0x929   :  { %p2659_p5 = scmp.ne.s32.totalorder %s2982_s3, %s2658_s2  ;;  %p2662_p6 = scmp.lt.u32.totalorder %s2658_s2, %s2982_s3 }
 0x92b   :  { %p2664_p7 = pnand %p2662_p6, %p2659_p5 }
 0x92d   :  { %2667 = shalt.err (!%p2664_p7)
}
 0x92e   :  { %1993 = dma.vmem_to_hbm [thread:$0]  %s1991_s27, 32, %s2982_s3, [#allocation3]  }
 0x92f   :  { %2668 = dma.done.wait [#allocation3], 32  }
 0x930   :  { %2669 = vsyncadd [#allocation3], 4294967264 }
 0x931   :  { %1997 = vsyncpa [#allocation3], 1 }

</bundles_post_ra>
